<compile_context>
chip_gen: v7x
topology: tpu7x:2x2x1
jax: 0.10.0
libtpu: 0.0.40
codegen_flags: <defaults>
</compile_context>

<pallas_src>
import functools
import math

import jax
import jax.numpy as jnp
import numpy as np
from jax.experimental import pallas as pl
from jax.experimental.pallas import tpu as pltpu


def _round_up(x, m):
    return ((x + m - 1) // m) * m


# ----------------------------------------------------------------------------
# ROIAlign (aligned=True, sampling_ratio=0) as a dense interpolation matrix
#   Wmat[r, bin, h*w]  with  roi_align(feat)[r, c, bin] = feat[c, :] @ Wmat[r, bin, :]
# Built separably (per-axis bilinear taps via scatter-add).
# ----------------------------------------------------------------------------
def _axis_bilinear_weights(start, bin_size, grid_n, P, G, n_pix):
    """Per-axis ROIAlign weights. Returns (R, P, n_pix) float32."""
    R = start.shape[0]
    pv = jnp.arange(P, dtype=jnp.float32)[None, :, None]
    gi = jnp.arange(G, dtype=jnp.int32)[None, None, :]
    gv = gi.astype(jnp.float32)
    b = bin_size[:, None, None]
    g = grid_n[:, None, None]
    gf = jnp.maximum(g, 1).astype(jnp.float32)

    pos = start[:, None, None] + pv * b + (gv + 0.5) * b / gf          # (R, P, G)
    mask = (gi < g) & (pos >= -1.0) & (pos <= n_pix)
    pc = jnp.maximum(pos, 0.0)
    lo = jnp.minimum(jnp.floor(pc).astype(jnp.int32), n_pix - 1)
    hi = jnp.minimum(lo + 1, n_pix - 1)
    pc = jnp.where(lo >= n_pix - 1, lo.astype(jnp.float32), pc)
    lw = pc - lo.astype(jnp.float32)
    hw = 1.0 - lw
    wnorm = mask.astype(jnp.float32) / gf                              # 1/grid per axis

    rr = jnp.arange(R)[:, None, None]
    pp = jnp.arange(P)[None, :, None]
    A = jnp.zeros((R, P, n_pix), jnp.float32)
    A = A.at[rr, pp, lo].add(hw * wnorm)                               # scatter-add 2 taps
    A = A.at[rr, pp, hi].add(lw * wnorm)
    return A


def roi_align_weights(boxes, H, W, PH, PW, spatial_scale, out_dtype=jnp.bfloat16):
    """boxes: (R, 4) = (x1, y1, x2, y2). Returns (R, PH*PW, H*W) in `out_dtype`."""
    boxes = boxes.astype(jnp.float32)
    R = boxes.shape[0]
    s = jnp.float32(spatial_scale)
    off = jnp.float32(0.5)                                   # aligned=True
    start_w = boxes[:, 0] * s - off
    start_h = boxes[:, 1] * s - off
    roi_w = boxes[:, 2] * s - off - start_w                  # aligned=True: no clamp to >= 1
    roi_h = boxes[:, 3] * s - off - start_h
    bin_h = roi_h / PH
    bin_w = roi_w / PW
    grid_h = jnp.ceil(roi_h / PH).astype(jnp.int32)          # sampling_ratio == 0
    grid_w = jnp.ceil(roi_w / PW).astype(jnp.int32)

    # Static sampling-grid bounds from the feature-map size only (keeps the
    # forward jit-able; boxes mostly inside the image).  Boxes whose scaled
    # extent exceeds the map lose the clipped samples (documented deviation).
    GY = max(1, -(-H // PH))
    GX = max(1, -(-W // PW))

    Ay = _axis_bilinear_weights(start_h, bin_h, grid_h, PH, GY, H)     # (R, PH, H)
    Ax = _axis_bilinear_weights(start_w, bin_w, grid_w, PW, GX, W)     # (R, PW, W)
    Wmat = jnp.einsum("rph,rqw->rpqhw", Ay, Ax)              # bilinear = separable outer prod
    return Wmat.reshape(R, PH * PW, H * W).astype(out_dtype)


# ----------------------------------------------------------------------------
# ROI grouping: sort ROIs by batch element, pack into batch-homogeneous tiles
# of TR slots (static tile count => jit-able).  Also emits per-tile fetch
# indices for dead tiles so their feat/w DMA repeats and is skipped [E].
# ----------------------------------------------------------------------------
def group_rois_by_batch(batch_idx, num_batch, tile_rois):
    R = int(batch_idx.shape[0])
    TR = tile_rois
    num_tiles = int(math.ceil(R / TR)) + num_batch            # static worst-case padding
    num_slots = num_tiles * TR

    batch_idx = jnp.clip(batch_idx, 0, num_batch - 1)         # guard OOB batch indices
    order = jnp.argsort(batch_idx)                            # ROIs sorted by batch element
    sorted_b = batch_idx[order]
    counts = jnp.zeros((num_batch,), jnp.int32).at[batch_idx].add(1)
    roi_starts = jnp.concatenate([jnp.zeros((1,), jnp.int32), jnp.cumsum(counts)[:-1]])
    rank = jnp.arange(R, dtype=jnp.int32) - roi_starts[sorted_b]
    tiles_per_b = (counts + TR - 1) // TR
    tile_starts = jnp.concatenate([jnp.zeros((1,), jnp.int32), jnp.cumsum(tiles_per_b)[:-1]])
    tile_of = tile_starts[sorted_b] + rank // TR
    slot_of = tile_of * TR + rank % TR

    n_real = jnp.sum(tiles_per_b).astype(jnp.int32)
    last_real = jnp.maximum(n_real - 1, 0)
    tids = jnp.arange(num_tiles, dtype=jnp.int32)

    tile_bidx = jnp.zeros((num_tiles,), jnp.int32).at[tile_of].set(sorted_b)
    # dead (trailing) tiles re-point at the last real tile so their DMA repeats
    tile_bidx = jnp.where(tids < n_real, tile_bidx, tile_bidx[last_real])
    tile_wfetch = jnp.minimum(tids, last_real)
    tile_nvalid = jnp.zeros((num_tiles,), jnp.int32).at[tile_of].add(1)

    roi_of_slot = jnp.zeros((num_slots,), jnp.int32).at[slot_of].set(order)
    valid = jnp.zeros((num_slots,), jnp.bool_).at[slot_of].set(True)
    slot_of_roi = jnp.zeros((R,), jnp.int32).at[order].set(slot_of)
    return (tile_bidx, tile_wfetch, tile_nvalid, roi_of_slot, valid,
            slot_of_roi, num_tiles)


# ----------------------------------------------------------------------------
# Pallas kernel #1: temporal AvgPool, channel-tiled, lane-padded bf16 output [F]
# ----------------------------------------------------------------------------
def _pick_channel_tile(C, T, HW, elem_bytes=4, budget_bytes=4 << 20):
    """Largest channel tile dividing C (multiple of 8 unless == C) keeping one
    (CT, T, HW) input block under ~4 MB (v7x 64 MiB VMEM-safe when buffered)."""
    ct = C
    while ct % 2 == 0 and (ct // 2) % 8 == 0 and ct * T * HW * elem_bytes > budget_bytes:
        ct //= 2
    return ct


def _tpool_kernel(x_ref, o_ref, *, hw, hw_pad):
    # AvgPool3d([T, 1, 1], stride=1) with temporal extent == T  ->  mean over T.
    x = x_ref[0].astype(jnp.float32)                           # (CT, T, HW)
    m = jnp.mean(x, axis=1)                                    # (CT, HW)
    if hw_pad != hw:                                           # lane-pad to 128 multiple
        m = jnp.concatenate(
            [m, jnp.zeros((m.shape[0], hw_pad - hw), m.dtype)], axis=-1)
    o_ref[0] = m.astype(o_ref.dtype)


def temporal_pool(x, hw_pad, out_dtype=jnp.bfloat16):
    """x: (N, C, T, H, W) -> (N, C, hw_pad) mean over T, zero-padded lanes, bf16."""
    N, C, T, H, W = (int(s) for s in x.shape)
    HW = H * W
    CT = _pick_channel_tile(C, T, HW, elem_bytes=x.dtype.itemsize)
    # TODO(synk): if upstream can hand over bf16 activations, read them in bf16
    # here (f32 accumulation in-kernel) to halve this pass's HBM traffic.
    return pl.pallas_call(
        functools.partial(_tpool_kernel, hw=HW, hw_pad=hw_pad),
        out_shape=jax.ShapeDtypeStruct((N, C, hw_pad), out_dtype),
        grid_spec=pltpu.PrefetchScalarGridSpec(
            num_scalar_prefetch=0,
            grid=(N, C // CT),
            in_specs=[pl.BlockSpec((1, CT, T, HW), lambda n, c: (n, c, 0, 0))],
            out_specs=pl.BlockSpec((1, CT, hw_pad), lambda n, c: (n, c, 0)),
        ),
        compiler_params=pltpu.CompilerParams(
            dimension_semantics=("parallel", "parallel")),
    )(x.reshape(N, C, T, HW))


# ----------------------------------------------------------------------------
# Pallas kernel #2 (fused): per ROI tile of TR ROIs
#   ROIAlign (one MXU matmul per geometry group) -> spatial MaxPool ->
#   Linear (bf16 MXU, f32 acc) -> softmax.
# ----------------------------------------------------------------------------
def _make_roi_head_kernel(num_groups, tile_rois, phws, group_chans):
    G, TR = num_groups, tile_rois

    def kernel(tile_bidx_ref, tile_wfetch_ref, tile_nvalid_ref, *refs):
        del tile_bidx_ref, tile_wfetch_ref     # consumed by the index_maps only
        feat_refs = refs[0:G]                  # (1, HW_pad_g, C_g) bf16, this tile's batch elem
        w_refs = refs[G:2 * G]                 # (1, TR*PHW_g, HW_pad_g) bf16 ROIAlign weights
        pw_refs = refs[2 * G:3 * G]            # (C_g, K_pad) bf16 projection slice
        pb_ref = refs[3 * G]                   # (1, K_pad) f32 bias (-1e30 on padded classes)
        o_ref = refs[3 * G + 1]                # (TR, K_pad) f32 class probabilities

        t = pl.program_id(0)

        @pl.when(tile_nvalid_ref[t] > 0)       # [E] skip fully-padded ROI tiles
        def _():
            logits = pb_ref[...]               # broadcasts to (TR, K_pad)
            for g in range(G):
                feat = feat_refs[g][0]         # (HW_pad, C_g) bf16
                w = w_refs[g][0]               # (TR*PHW, HW_pad) bf16
                # ROIAlign for TR ROIs at once: single MXU matmul (bf16 in / f32 acc).
                bins = jnp.dot(w, feat, preferred_element_type=jnp.float32)
                # MaxPool2d(resolution) == max over the PHW bins of each ROI.
                pooled = jnp.max(bins.reshape(TR, phws[g], group_chans[g]), axis=1)
                # Linear: per-group slice of the projection (block matmul == concat+matmul).
                logits = logits + jnp.dot(pooled.astype(jnp.bfloat16), pw_refs[g][...],
                                          preferred_element_type=jnp.float32)

            # TODO(synk): PyTorch uses nn.Softmax(dim=4) on a 2-D tensor (would
            # raise); the intended class-dim softmax is implemented instead.
            m = jnp.max(logits, axis=-1, keepdims=True)
            e = jnp.exp(logits - m)
            o_ref[...] = e * pl.reciprocal(jnp.sum(e, axis=-1, keepdims=True), approx=True)

    return kernel


# ----------------------------------------------------------------------------
# Full ResNetRoIHead forward
# ----------------------------------------------------------------------------
def resnet_roi_head_forward(inputs, bboxes, params, resolution, scale_factor,
                            roi_tile=16):
    """inputs: list of (N, C_p, T_p, H_p, W_p); bboxes: (R, 5) = (batch_idx, x1, y1, x2, y2)."""
    N = int(inputs[0].shape[0])
    batch_idx = bboxes[:, 0].astype(jnp.int32)
    coords = bboxes[:, 1:5]

    # --- [D] group pathways sharing ROIAlign geometry (slow/fast in SlowFast) ---
    group_keys, group_pids = [], {}
    for p, x in enumerate(inputs):
        H, W = int(x.shape[3]), int(x.shape[4])
        PH, PW = resolution[p]
        key = (H, W, PH, PW, float(scale_factor[p]))
        if key not in group_pids:
            group_pids[key] = []
            group_keys.append(key)
        group_pids[key].append(p)
    G = len(group_keys)

    # --- temporal AvgPool once per feature map, lane-padded bf16 output [C][F] ---
    pooled = []
    for p, x in enumerate(inputs):
        H, W = int(x.shape[3]), int(x.shape[4])
        pooled.append(temporal_pool(x, _round_up(H * W, 128)))        # (N, C_p, HW_pad)

    # --- batch-homogeneous ROI tiles of TR slots ---
    TR = roi_tile           # [A] 16 fills the 256-wide MXU on v6e/v7x; 8 matches v5e
    (tile_bidx, tile_wfetch, tile_nvalid, roi_of_slot, valid,
     slot_of_roi, num_tiles) = group_rois_by_batch(batch_idx, N, TR)

    # --- per-group operands ---
    K = int(params["proj_w"].shape[0])
    K_pad = _round_up(K, 128)
    chans = [int(x.shape[1]) for x in inputs]
    offs = np.concatenate([[0], np.cumsum(chans)]).astype(int)

    group_feats, group_wslots, group_pw = [], [], []
    group_phw, group_ch, group_hwp = [], [], []
    for key in group_keys:
        pids = group_pids[key]
        H, W, PH, PW, scale = key
        hw_pad = _round_up(H * W, 128)
        phw = PH * PW

        # fused pathways: pooled features concatenated along C, laid out (N, HW_pad, C_g)
        # so the in-kernel ROIAlign matmul is a plain (TR*PHW, HW_pad) x (HW_pad, C_g).
        feat_g = jnp.concatenate([jnp.swapaxes(pooled[p], 1, 2) for p in pids], axis=2)
        C_g = int(feat_g.shape[2])

        # shared ROIAlign interpolation matrix, zero-padded to HW_pad lanes [C]
        wm = roi_align_weights(coords, H, W, PH, PW, 1.0 / scale)      # (R, PHW, HW) bf16
        if hw_pad != H * W:
            wm = jnp.concatenate(
                [wm, jnp.zeros((wm.shape[0], phw, hw_pad - H * W), wm.dtype)], axis=-1)
        w = wm[roi_of_slot] * valid[:, None, None].astype(wm.dtype)
        group_wslots.append(w.reshape(num_tiles, TR * phw, hw_pad))

        # [B] bf16 projection slice for this group's concatenated channels, K padded to 128
        pw_cols = jnp.concatenate(
            [params["proj_w"][:, offs[p]:offs[p] + chans[p]] for p in pids], axis=1)
        group_pw.append(jnp.zeros((C_g, K_pad), jnp.bfloat16).at[:, :K].set(
            pw_cols.T.astype(jnp.bfloat16)))

        group_feats.append(feat_g)
        group_phw.append(phw)
        group_ch.append(C_g)
        group_hwp.append(hw_pad)

    # bias; padded classes get -1e30 so they vanish under softmax (f32-safe;
    # switch to jnp.finfo(dtype).min if the logit dtype ever changes).
    pb = jnp.full((1, K_pad), -1e30, jnp.float32).at[0, :K].set(
        params["proj_b"].astype(jnp.float32))

    kernel = _make_roi_head_kernel(G, TR, group_phw, group_ch)

    in_specs = []
    for g in range(G):
        # Data-dependent block pick: pooled features of this tile's batch element.
        # Tiles are sorted by batch, so repeated block indices skip the DMA.
        in_specs.append(pl.BlockSpec((1, group_hwp[g], group_ch[g]),
                                     lambda t, tb, wf, nv: (tb[t], 0, 0)))
    for g in range(G):
        in_specs.append(pl.BlockSpec((1, TR * group_phw[g], group_hwp[g]),
                                     lambda t, tb, wf, nv: (wf[t], 0, 0)))
    for g in range(G):
        # TODO(synk): mark these constant-index operands pipeline_mode=pl.Buffered(1)
        # to drop their redundant second VMEM buffer once that mode is validated here.
        in_specs.append(pl.BlockSpec((group_ch[g], K_pad),
                                     lambda t, tb, wf, nv: (0, 0)))
    in_specs.append(pl.BlockSpec((1, K_pad), lambda t, tb, wf, nv: (0, 0)))

    # [H] VMEM budget: double-buffered feat/w/pw/pb/out + the f32 `bins` intermediate.
    vmem_bytes = 2 * K_pad * 4 + 2 * TR * K_pad * 4
    for g in range(G):
        vmem_bytes += 2 * group_hwp[g] * group_ch[g] * 2               # feat bf16 x2
        vmem_bytes += 2 * TR * group_phw[g] * group_hwp[g] * 2         # w tile bf16 x2
        vmem_bytes += 2 * group_ch[g] * K_pad * 2                      # pw bf16 x2
        vmem_bytes += TR * group_phw[g] * group_ch[g] * 4              # bins f32
    vmem_limit = int(min(48 << 20, max(16 << 20, 2 * vmem_bytes + (4 << 20))))

    out = pl.pallas_call(
        kernel,
        out_shape=jax.ShapeDtypeStruct((num_tiles * TR, K_pad), jnp.float32),
        grid_spec=pltpu.PrefetchScalarGridSpec(
            num_scalar_prefetch=3,
            grid=(num_tiles,),
            in_specs=in_specs,
            out_specs=pl.BlockSpec((TR, K_pad), lambda t, tb, wf, nv: (t, 0)),
        ),
        compiler_params=pltpu.CompilerParams(
            dimension_semantics=("parallel",),      # independent tiles (2 TCs on v7x)
            vmem_limit_bytes=vmem_limit,
        ),
    )(tile_bidx, tile_wfetch, tile_nvalid, *group_feats, *group_wslots, *group_pw, pb)

    # dropout_rate == 0.0 -> no dropout module in the PyTorch __init__.
    # Undo the ROI-tile permutation and strip the class padding.
    return out[slot_of_roi, :K]


# ----------------------------------------------------------------------------
# Pure-JAX reference (same bf16 rounding points as the kernel path)
# ----------------------------------------------------------------------------
def reference_forward(inputs, bboxes, params, resolution, scale_factor):
    batch_idx = bboxes[:, 0].astype(jnp.int32)
    coords = bboxes[:, 1:5]
    pooled = []
    for p, x in enumerate(inputs):
        N, C, T, H, W = x.shape
        PH, PW = resolution[p]
        feat = jnp.mean(x.astype(jnp.float32), axis=2).reshape(N, C, H * W)
        feat = feat.astype(jnp.bfloat16).astype(jnp.float32)
        wm = roi_align_weights(coords, H, W, PH, PW, 1.0 / scale_factor[p]).astype(jnp.float32)
        bins = jnp.einsum("rcs,rps->rcp", feat[batch_idx], wm)
        pooled.append(jnp.max(bins, axis=2))
    xcat = jnp.concatenate(pooled, axis=1)
    xcat = xcat.astype(jnp.bfloat16).astype(jnp.float32)       # match bf16 MXU inputs
    pw = params["proj_w"].astype(jnp.bfloat16).astype(jnp.float32)
    logits = xcat @ pw.T + params["proj_b"].astype(jnp.float32)
    return jax.nn.softmax(logits, axis=-1)


if __name__ == "__main__":
    # Module configuration (small, consistent with the PyTorch __init__).
    dim_in = [8, 4]
    num_classes = 16
    pool_size = [[4, 1, 1], [8, 1, 1]]      # temporal pool == T of each pathway
    resolution = [[4, 4], [4, 4]]
    scale_factor = [4, 4]
    N, H, W = 2, 8, 8
    R = 3

    key = jax.random.PRNGKey(0)
    k0, k1, kw, kb = jax.random.split(key, 4)
    x0 = jax.random.normal(k0, (N, dim_in[0], pool_size[0][0], H, W), dtype=jnp.float32)
    x1 = jax.random.normal(k1, (N, dim_in[1], pool_size[1][0], H, W), dtype=jnp.float32)

    # ROIs: (batch_index, x1, y1, x2, y2) in the original 32x32 image frame.
    bboxes = jnp.array(
        [[0.0, 2.0, 3.0, 21.0, 27.0],
         [1.0, 4.5, 1.0, 30.0, 18.5],
         [0.0, 0.0, 0.0, 31.0, 31.0]], dtype=jnp.float32)

    # Deterministic synthetic nn.Linear(sum(dim_in), num_classes) parameters.
    D = sum(dim_in)
    fan = 1.0 / math.sqrt(D)
    params = {
        "proj_w": jax.random.uniform(kw, (num_classes, D), jnp.float32, -fan, fan),
        "proj_b": jax.random.uniform(kb, (num_classes,), jnp.float32, -fan, fan),
    }

    fwd = jax.jit(functools.partial(resnet_roi_head_forward,
                                    resolution=resolution,
                                    scale_factor=scale_factor,
                                    roi_tile=16))
    out = jax.block_until_ready(fwd([x0, x1], bboxes, params))

    assert out.shape == (R, num_classes)
    # softmax rows sum to ~1 (approx reciprocal -> loose tolerance)
    np.testing.assert_allclose(np.asarray(out).sum(axis=-1), 1.0, atol=1e-2)
    ref = np.asarray(reference_forward([x0, x1], bboxes, params, resolution, scale_factor))
    np.testing.assert_allclose(np.asarray(out), ref, atol=2e-2, rtol=0)
    print("KERNEL_OK")
</pallas_src>

<mosaic_0001>
module attributes {stable_mosaic.version = 11 : i64} {
  func.func @_tpool_kernel(%arg0: i32, %arg1: i32, %arg2: memref<1x4x8x64xf32, #tpu.memory_space<vmem>>, %arg3: memref<1x4x128xbf16, #tpu.memory_space<vmem>>) attributes {dimension_semantics = [#tpu.dimension_semantics<parallel>, #tpu.dimension_semantics<parallel>], iteration_bounds = array<i64: 2, 1>, scalar_prefetch = 0 : i64, scratch_operands = 0 : i64, tpu.core_type = #tpu.core_type<tc>, window_params = [{transform_indices = @transform_0, window_bounds = array<i64: 1, 4, 8, 64>}, {transform_indices = @transform_1, window_bounds = array<i64: 1, 4, 128>}]} {
    %c0 = arith.constant 0 : index
    %c0_0 = arith.constant 0 : index
    %c0_1 = arith.constant 0 : index
    %c0_2 = arith.constant 0 : index
    %0 = vector.load %arg2[%c0, %c0_0, %c0_1, %c0_2] : memref<1x4x8x64xf32, #tpu.memory_space<vmem>>, vector<1x4x8x64xf32>
    %1 = vector.shape_cast %0 : vector<1x4x8x64xf32> to vector<4x8x64xf32>
    %cst = arith.constant dense<0.000000e+00> : vector<4x64xf32>
    %2 = vector.multi_reduction <add>, %1, %cst [1] : vector<4x8x64xf32> to vector<4x64xf32>
    %cst_3 = arith.constant 8.000000e+00 : f32
    %3 = vector.broadcast %cst_3 : f32 to vector<4x64xf32>
    %4 = arith.divf %2, %3 : vector<4x64xf32>
    %cst_4 = arith.constant 0.000000e+00 : f32
    %5 = vector.broadcast %cst_4 : f32 to vector<4x64xf32>
    %6 = tpu.concatenate %4, %5 in 1 : vector<4x64xf32>, vector<4x64xf32> -> vector<4x128xf32>
    %7 = arith.truncf %6 : vector<4x128xf32> to vector<4x128xbf16>
    %c0_5 = arith.constant 0 : index
    %c0_6 = arith.constant 0 : index
    %c0_7 = arith.constant 0 : index
    %8 = vector.load %arg3[%c0_5, %c0_6, %c0_7] : memref<1x4x128xbf16, #tpu.memory_space<vmem>>, vector<1x4x128xbf16>
    %9 = vector.shape_cast %8 : vector<1x4x128xbf16> to vector<4x128xbf16>
    %10 = vector.shape_cast %7 : vector<4x128xbf16> to vector<1x4x128xbf16>
    tpu.vector_store %arg3[%c0_5, %c0_6, %c0_7], %10 {strides = array<i32>} : memref<1x4x128xbf16, #tpu.memory_space<vmem>>, vector<1x4x128xbf16>,
    return
  }
  func.func @transform_0(%arg0: i32, %arg1: i32) -> (i32, i32, i32, i32) {
    %c0_i32 = arith.constant 0 : i32
    %c0_i32_0 = arith.constant 0 : i32
    %c0_i32_1 = arith.constant 0 : i32
    return %arg0, %arg1, %c0_i32, %c0_i32_0 : i32, i32, i32, i32
  }
  func.func @transform_1(%arg0: i32, %arg1: i32) -> (i32, i32, i32) {
    %c0_i32 = arith.constant 0 : i32
    %c0_i32_0 = arith.constant 0 : i32
    return %arg0, %arg1, %c0_i32 : i32, i32, i32
  }
}

module attributes {stable_mosaic.version = 11 : i64} {
  func.func @_tpool_kernel(%arg0: i32, %arg1: i32, %arg2: memref<1x8x4x64xf32, #tpu.memory_space<vmem>>, %arg3: memref<1x8x128xbf16, #tpu.memory_space<vmem>>) attributes {dimension_semantics = [#tpu.dimension_semantics<parallel>, #tpu.dimension_semantics<parallel>], iteration_bounds = array<i64: 2, 1>, scalar_prefetch = 0 : i64, scratch_operands = 0 : i64, tpu.core_type = #tpu.core_type<tc>, window_params = [{transform_indices = @transform_0, window_bounds = array<i64: 1, 8, 4, 64>}, {transform_indices = @transform_1, window_bounds = array<i64: 1, 8, 128>}]} {
    %c0 = arith.constant 0 : index
    %c0_0 = arith.constant 0 : index
    %c0_1 = arith.constant 0 : index
    %c0_2 = arith.constant 0 : index
    %0 = vector.load %arg2[%c0, %c0_0, %c0_1, %c0_2] : memref<1x8x4x64xf32, #tpu.memory_space<vmem>>, vector<1x8x4x64xf32>
    %1 = vector.shape_cast %0 : vector<1x8x4x64xf32> to vector<8x4x64xf32>
    %cst = arith.constant dense<0.000000e+00> : vector<8x64xf32>
    %2 = vector.multi_reduction <add>, %1, %cst [1] : vector<8x4x64xf32> to vector<8x64xf32>
    %cst_3 = arith.constant 4.000000e+00 : f32
    %3 = vector.broadcast %cst_3 : f32 to vector<8x64xf32>
    %4 = arith.divf %2, %3 : vector<8x64xf32>
    %cst_4 = arith.constant 0.000000e+00 : f32
    %5 = vector.broadcast %cst_4 : f32 to vector<8x64xf32>
    %6 = tpu.concatenate %4, %5 in 1 : vector<8x64xf32>, vector<8x64xf32> -> vector<8x128xf32>
    %7 = arith.truncf %6 : vector<8x128xf32> to vector<8x128xbf16>
    %c0_5 = arith.constant 0 : index
    %c0_6 = arith.constant 0 : index
    %c0_7 = arith.constant 0 : index
    %8 = vector.load %arg3[%c0_5, %c0_6, %c0_7] : memref<1x8x128xbf16, #tpu.memory_space<vmem>>, vector<1x8x128xbf16>
    %9 = vector.shape_cast %8 : vector<1x8x128xbf16> to vector<8x128xbf16>
    %10 = vector.shape_cast %7 : vector<8x128xbf16> to vector<1x8x128xbf16>
    tpu.vector_store %arg3[%c0_5, %c0_6, %c0_7], %10 {strides = array<i32>} : memref<1x8x128xbf16, #tpu.memory_space<vmem>>, vector<1x8x128xbf16>,
    return
  }
  func.func @transform_0(%arg0: i32, %arg1: i32) -> (i32, i32, i32, i32) {
    %c0_i32 = arith.constant 0 : i32
    %c0_i32_0 = arith.constant 0 : i32
    %c0_i32_1 = arith.constant 0 : i32
    return %arg0, %arg1, %c0_i32, %c0_i32_0 : i32, i32, i32, i32
  }
  func.func @transform_1(%arg0: i32, %arg1: i32) -> (i32, i32, i32) {
    %c0_i32 = arith.constant 0 : i32
    %c0_i32_0 = arith.constant 0 : i32
    return %arg0, %arg1, %c0_i32 : i32, i32, i32
  }
}

module attributes {stable_mosaic.version = 11 : i64} {
  func.func @kernel(%arg0: i32, %arg1: memref<3xi32, #tpu.memory_space<smem>>, %arg2: memref<3xi32, #tpu.memory_space<smem>>, %arg3: memref<3xi32, #tpu.memory_space<smem>>, %arg4: memref<1x128x12xbf16, #tpu.memory_space<vmem>>, %arg5: memref<1x256x128xbf16, #tpu.memory_space<vmem>>, %arg6: memref<12x128xbf16, #tpu.memory_space<vmem>>, %arg7: memref<1x128xf32, #tpu.memory_space<vmem>>, %arg8: memref<16x128xf32, #tpu.memory_space<vmem>>) attributes {dimension_semantics = [#tpu.dimension_semantics<parallel>], iteration_bounds = array<i64: 3>, scalar_prefetch = 3 : i64, scratch_operands = 0 : i64, tpu.core_type = #tpu.core_type<tc>, window_params = [{transform_indices = @transform_0, window_bounds = array<i64: 1, 128, 12>}, {transform_indices = @transform_1, window_bounds = array<i64: 1, 256, 128>}, {pipeline_mode = #tpu.pipeline_mode<synchronous>, transform_indices = @transform_2, window_bounds = array<i64: 12, 128>}, {pipeline_mode = #tpu.pipeline_mode<synchronous>, transform_indices = @transform_3, window_bounds = array<i64: 1, 128>}, {transform_indices = @transform_4, window_bounds = array<i64: 16, 128>}]} {
    %0 = arith.index_cast %arg0 : i32 to index
    %1 = memref.load %arg3[%0] : memref<3xi32, #tpu.memory_space<smem>>
    %c0_i32 = arith.constant 0 : i32
    %2 = arith.cmpi sgt, %1, %c0_i32 : i32
    %3 = arith.extui %2 : i1 to i32
    %c0_i32_0 = arith.constant 0 : i32
    %4 = arith.cmpi ne, %3, %c0_i32_0 : i32
    scf.if %4 {
      %c0 = arith.constant 0 : index
      %c0_1 = arith.constant 0 : index
      %5 = vector.load %arg7[%c0, %c0_1] : memref<1x128xf32, #tpu.memory_space<vmem>>, vector<1x128xf32>
      %c0_2 = arith.constant 0 : index
      %c0_3 = arith.constant 0 : index
      %c0_4 = arith.constant 0 : index
      %6 = vector.load %arg4[%c0_2, %c0_3, %c0_4] : memref<1x128x12xbf16, #tpu.memory_space<vmem>>, vector<1x128x12xbf16>
      %7 = vector.shape_cast %6 : vector<1x128x12xbf16> to vector<128x12xbf16>
      %c0_5 = arith.constant 0 : index
      %c0_6 = arith.constant 0 : index
      %c0_7 = arith.constant 0 : index
      %8 = vector.load %arg5[%c0_5, %c0_6, %c0_7] : memref<1x256x128xbf16, #tpu.memory_space<vmem>>, vector<1x256x128xbf16>
      %9 = vector.shape_cast %8 : vector<1x256x128xbf16> to vector<256x128xbf16>
      %cst = arith.constant dense<0.000000e+00> : vector<256x12xf32>
      %10 = tpu.matmul %9, %7, %cst {dimension_numbers = #tpu.dot_dimension_numbers<[1], [0], [0], [1], [0, 0, 1, 1], [], []>} : vector<256x128xbf16>, vector<128x12xbf16>, vector<256x12xf32> -> vector<256x12xf32>
      %11 = vector.shape_cast %10 : vector<256x12xf32> to vector<16x16x12xf32>
      %cst_8 = arith.constant dense<0xFF800000> : vector<16x12xf32>
      %12 = vector.multi_reduction <maximumf>, %11, %cst_8 [1] : vector<16x16x12xf32> to vector<16x12xf32>
      %13 = arith.truncf %12 : vector<16x12xf32> to vector<16x12xbf16>
      %c0_9 = arith.constant 0 : index
      %c0_10 = arith.constant 0 : index
      %14 = vector.load %arg6[%c0_9, %c0_10] : memref<12x128xbf16, #tpu.memory_space<vmem>>, vector<12x128xbf16>
      %cst_11 = arith.constant dense<0.000000e+00> : vector<16x128xf32>
      %15 = tpu.matmul %13, %14, %cst_11 {dimension_numbers = #tpu.dot_dimension_numbers<[1], [0], [0], [1], [0, 0, 1, 1], [], []>} : vector<16x12xbf16>, vector<12x128xbf16>, vector<16x128xf32> -> vector<16x128xf32>
      %16 = vector.broadcast %5 : vector<1x128xf32> to vector<16x128xf32>
      %17 = arith.addf %16, %15 : vector<16x128xf32>
      %cst_12 = arith.constant dense<0xFF800000> : vector<16xf32>
      %18 = vector.multi_reduction <maximumf>, %17, %cst_12 [1] : vector<16x128xf32> to vector<16xf32>
      %19 = vector.shape_cast %18 : vector<16xf32> to vector<16x1xf32>
      %20 = vector.broadcast %19 : vector<16x1xf32> to vector<16x128xf32>
      %21 = arith.subf %17, %20 : vector<16x128xf32>
      %22 = math.exp %21 : vector<16x128xf32>
      %cst_13 = arith.constant dense<0.000000e+00> : vector<16xf32>
      %23 = vector.multi_reduction <add>, %22, %cst_13 [1] : vector<16x128xf32> to vector<16xf32>
      %24 = vector.shape_cast %23 : vector<16xf32> to vector<16x1xf32>
      %25 = tpu.reciprocal %24 {approx = true} : vector<16x1xf32> -> vector<16x1xf32>
      %26 = vector.broadcast %25 : vector<16x1xf32> to vector<16x128xf32>
      %27 = arith.mulf %22, %26 : vector<16x128xf32>
      %c0_14 = arith.constant 0 : index
      %c0_15 = arith.constant 0 : index
      %28 = vector.load %arg8[%c0_14, %c0_15] : memref<16x128xf32, #tpu.memory_space<vmem>>, vector<16x128xf32>
      tpu.vector_store %arg8[%c0_14, %c0_15], %27 {strides = array<i32>} : memref<16x128xf32, #tpu.memory_space<vmem>>, vector<16x128xf32>,
    } else {
    }
    return
  }
  func.func @transform_0(%arg0: i32, %arg1: memref<3xi32, #tpu.memory_space<smem>>, %arg2: memref<3xi32, #tpu.memory_space<smem>>, %arg3: memref<3xi32, #tpu.memory_space<smem>>) -> (i32, i32, i32) {
    %0 = arith.index_cast %arg0 : i32 to index
    %1 = memref.load %arg1[%0] : memref<3xi32, #tpu.memory_space<smem>>
    %c0_i32 = arith.constant 0 : i32
    %c0_i32_0 = arith.constant 0 : i32
    %c0_i32_1 = arith.constant 0 : i32
    return %1, %c0_i32, %c0_i32_0 : i32, i32, i32
  }
  func.func @transform_1(%arg0: i32, %arg1: memref<3xi32, #tpu.memory_space<smem>>, %arg2: memref<3xi32, #tpu.memory_space<smem>>, %arg3: memref<3xi32, #tpu.memory_space<smem>>) -> (i32, i32, i32) {
    %0 = arith.index_cast %arg0 : i32 to index
    %1 = memref.load %arg2[%0] : memref<3xi32, #tpu.memory_space<smem>>
    %c0_i32 = arith.constant 0 : i32
    %c0_i32_0 = arith.constant 0 : i32
    %c0_i32_1 = arith.constant 0 : i32
    return %1, %c0_i32, %c0_i32_0 : i32, i32, i32
  }
  func.func @transform_2(%arg0: i32, %arg1: memref<3xi32, #tpu.memory_space<smem>>, %arg2: memref<3xi32, #tpu.memory_space<smem>>, %arg3: memref<3xi32, #tpu.memory_space<smem>>) -> (i32, i32) {
    %c0_i32 = arith.constant 0 : i32
    %c0_i32_0 = arith.constant 0 : i32
    %c0_i32_1 = arith.constant 0 : i32
    return %c0_i32, %c0_i32_0 : i32, i32
  }
  func.func @transform_3(%arg0: i32, %arg1: memref<3xi32, #tpu.memory_space<smem>>, %arg2: memref<3xi32, #tpu.memory_space<smem>>, %arg3: memref<3xi32, #tpu.memory_space<smem>>) -> (i32, i32) {
    %c0_i32 = arith.constant 0 : i32
    %c0_i32_0 = arith.constant 0 : i32
    %c0_i32_1 = arith.constant 0 : i32
    return %c0_i32, %c0_i32_0 : i32, i32
  }
  func.func @transform_4(%arg0: i32, %arg1: memref<3xi32, #tpu.memory_space<smem>>, %arg2: memref<3xi32, #tpu.memory_space<smem>>, %arg3: memref<3xi32, #tpu.memory_space<smem>>) -> (i32, i32) {
    %c0_i32 = arith.constant 0 : i32
    %c0_i32_0 = arith.constant 0 : i32
    return %arg0, %c0_i32 : i32, i32
  }
}

</mosaic_0001>

<bundles_post_ra>
// kernel: resnet_roi_head_forward.3
= control target key start
LH: loop header
LB: loop body
LE: loop exit
PB: predicated region body
PF: predicated region fallthrough
CT: control target
= control target key end

     0   :  { %s398_s6 = smov 0   ;;  %s400_s7 = smov 0   ;;  %s446_s0 = inlined_call_operand.vmem [shape: f32[2,8,4,64], index: 0, kind: input, shape index: {}]   ;;  %s447_s1 = inlined_call_operand.vmem [shape: bf16[2,8,128], index: 1, kind: output, shape index: {}]  }
   0x1   :  { %s402_s8 = smov 0  }
   0x2 LB: > { %s23_s9 = sadd.s32 1, %s382_s7  ;;  %p333_p0 = scmp.ge.s32.totalorder %s386_s8, 1  ;;  %s386_s8 = sphi %s402_s8, %s11_s8   ;;  %s382_s7 = sphi %s400_s7, %s449_s7   ;;  %s378_s6 = sphi %s398_s6, %s448_s6  }
   0x3   : > { %p25_p1 = scmp.ge.s32.totalorder %s23_s9, 2  ;;  %p108_p2 = scmp.lt.s32.totalorder %s386_s8, 3 }
   0x5   : > { %s451_s9 = smov (%p25_p1, %s23_s9), 0  ;;  %p109_p3 = pnand %p333_p0, %p108_p2 }
   0x6   : > { %p135_p4 = scmp.lt.s32.totalorder (!%p109_p3), %s378_s6, 1  ;;  %vm159_vm0 = vcmask (!%p109_p3), 519168   ;;  %vm233_vm1 = vcmask (!%p109_p3), 1041409   ;;  %vm235_vm2 = vcmask (!%p109_p3), 1042434   ;;  %vm237_vm3 = vcmask (!%p109_p3), 1043459  }
   0x7   : > { %112 = sbr.rel (%p109_p3) target bundleno = 45 (0x2d), region = 24  ;;  %vm239_vm4 = vcmask (!%p109_p3), 1044484   ;;  %vm241_vm5 = vcmask (!%p109_p3), 1045509   ;;  %vm243_vm6 = vcmask (!%p109_p3), 1046534   ;;  %vm245_vm7 = vcmask (!%p109_p3), 1047559  }
   0x8   : > { %vm248_vm8 = vcmask (!%p109_p3), 523264  }
   0xe   : > { %s453_s6 = smov (!%p135_p4, %s378_s6), 1 }
   0xf   : > { %s339_s10 = sshll.u32 %s453_s6, 5  ;;  %s336_s14 = sshll.u32 %s453_s6, 2 }
  0x10   : > { %s142_s13 = scalar_lea.vmem %s446_s0, %s339_s10  ;;  %s150_s17 = scalar_lea.vmem %s447_s1, %s336_s14 }
  0x11   : > { %v151_v0 = vld [vmem:[%s142_s13] sm:$0xf]  ;;  %v152_v1 = vld [vmem:[%s142_s13 + $0x4] sm:$0xf]  ;;  %v153_v2 = vld [vmem:[%s142_s13 + $0x8] sm:$0xf] }
  0x12   : > { %v154_v3 = vld [vmem:[%s142_s13 + $0xc] sm:$0xf]  ;;  %v155_v4 = vld [vmem:[%s142_s13 + $0x10] sm:$0xf]  ;;  %v156_v5 = vld [vmem:[%s142_s13 + $0x14] sm:$0xf] }
  0x13   : > { %v157_v6 = vld [vmem:[%s142_s13 + $0x18] sm:$0xf]  ;;  %v160_v7 = vsel %vm159_vm0, %v151_v0, 0.0  ;;  %v167_v8 = vsel %vm159_vm0, %v152_v1, 0.0  ;;  %v158_v9 = vld [vmem:[%s142_s13 + $0x1c] sm:$0xf] }
  0x14   : > { %v161_v10 = vrot.slane %v160_v7, 4  ;;  %v168_v11 = vrot.slane %v167_v8, 4  ;;  %v174_v12 = vsel %vm159_vm0, %v153_v2, 0.0  ;;  %v181_v13 = vsel %vm159_vm0, %v154_v3, 0.0 }
  0x15   : > { %v175_v14 = vrot.slane %v174_v12, 4  ;;  %v182_v15 = vrot.slane %v181_v13, 4  ;;  %v188_v16 = vsel %vm159_vm0, %v155_v4, 0.0  ;;  %v195_v17 = vsel %vm159_vm0, %v156_v5, 0.0 }
  0x16   : > { %v162_v18 = vadd.f32 %v161_v10, %v160_v7  ;;  %v169_v19 = vadd.f32 %v168_v11, %v167_v8  ;;  %v189_v20 = vrot.slane %v188_v16, 4  ;;  %v196_v21 = vrot.slane %v195_v17, 4 }
  0x17   : > { %v176_v22 = vadd.f32 %v175_v14, %v174_v12  ;;  %v183_v23 = vadd.f32 %v182_v15, %v181_v13  ;;  %v202_v24 = vsel %vm159_vm0, %v157_v6, 0.0  ;;  %v209_v25 = vsel %vm159_vm0, %v158_v9, 0.0 }
  0x18   : > { %v163_v26 = vrot.slane %v162_v18, 2  ;;  %v170_v27 = vrot.slane %v169_v19, 2  ;;  %v190_v28 = vadd.f32 %v189_v20, %v188_v16  ;;  %v197_v29 = vadd.f32 %v196_v21, %v195_v17 }
  0x19   : > { %v177_v30 = vrot.slane %v176_v22, 2  ;;  %v184_v31 = vrot.slane %v183_v23, 2  ;;  %v203_v32 = vrot.slane %v202_v24, 4  ;;  %v210_v33 = vrot.slane %v209_v25, 4 }
  0x1a   : > { %v164_v34 = vadd.f32 %v163_v26, %v162_v18  ;;  %v171_v35 = vadd.f32 %v170_v27, %v169_v19  ;;  %v191_v36 = vrot.slane %v190_v28, 2  ;;  %v198_v37 = vrot.slane %v197_v29, 2 }
  0x1b   : > { %v178_v38 = vadd.f32 %v177_v30, %v176_v22  ;;  %v185_v39 = vadd.f32 %v184_v31, %v183_v23  ;;  %v204_v40 = vadd.f32 %v203_v32, %v202_v24  ;;  %v211_v41 = vadd.f32 %v210_v33, %v209_v25 }
  0x1c   : > { %v165_v42 = vrot.slane %v164_v34, 1  ;;  %v172_v43 = vrot.slane %v171_v35, 1  ;;  %v192_v44 = vadd.f32 %v191_v36, %v190_v28  ;;  %v199_v45 = vadd.f32 %v198_v37, %v197_v29 }
  0x1d   : > { %v179_v46 = vrot.slane %v178_v38, 1  ;;  %v186_v47 = vrot.slane %v185_v39, 1  ;;  %v205_v48 = vrot.slane %v204_v40, 2  ;;  %v212_v49 = vrot.slane %v211_v41, 2 }
  0x1e   : > { %v166_v50 = vadd.f32 %v165_v42, %v164_v34  ;;  %v173_v51 = vadd.f32 %v172_v43, %v171_v35  ;;  %v193_v52 = vrot.slane %v192_v44, 1  ;;  %v200_v53 = vrot.slane %v199_v45, 1 }
  0x1f   : > { %v180_v54 = vadd.f32 %v179_v46, %v178_v38  ;;  %v187_v55 = vadd.f32 %v186_v47, %v185_v39  ;;  %v206_v56 = vadd.f32 %v205_v48, %v204_v40  ;;  %v213_v57 = vadd.f32 %v212_v49, %v211_v41 }
  0x20   : > { %v194_v58 = vadd.f32 %v193_v52, %v192_v44  ;;  %v201_v59 = vadd.f32 %v200_v53, %v199_v45  ;;  %v217_v60 = vmul.f32 0.25, %v166_v50  ;;  %v218_v61 = vmul.f32 0.25, %v173_v51 }
  0x21   : > { %v207_v62 = vrot.slane %v206_v56, 1  ;;  %v214_v63 = vrot.slane %v213_v57, 1  ;;  %v219_v0 = vmul.f32 0.25, %v180_v54  ;;  %v220_v1 = vmul.f32 0.25, %v187_v55 }
  0x22   : > { %v221_v2 = vmul.f32 0.25, %v194_v58  ;;  %v222_v3 = vmul.f32 0.25, %v201_v59  ;;  %v234_v4 = vsel %vm233_vm1, %v218_v61, %v217_v60 }
  0x23   : > { %v208_v5 = vadd.f32 %v207_v62, %v206_v56  ;;  %v215_v6 = vadd.f32 %v214_v63, %v213_v57  ;;  %v236_v7 = vsel %vm235_vm2, %v219_v0, %v234_v4 }
  0x24   : > { %v238_v8 = vsel %vm237_vm3, %v220_v1, %v236_v7 }
  0x25   : > { %v223_v9 = vmul.f32 0.25, %v208_v5  ;;  %v224_v10 = vmul.f32 0.25, %v215_v6  ;;  %v240_v11 = vsel %vm239_vm4, %v221_v2, %v238_v8 }
  0x26   : > { %v242_v12 = vsel %vm241_vm5, %v222_v3, %v240_v11 }
  0x27   : > { %v244_v13 = vsel %vm243_vm6, %v223_v9, %v242_v12 }
  0x28   : > { %v246_v14 = vsel %vm245_vm7, %v224_v10, %v244_v13 }
  0x29   : > { %v249_v15 = vsel %vm248_vm8, %v246_v14, 0.0 }
  0x2a   : > { %v250_v16 = vpack.c.bf16 %v249_v15, %v249_v15 }
  0x2c   : > { %251 = vst [vmem:[%s150_s17] sm:$0xf] %v250_v16 }
  0x2d PF: > { %s11_s8 = sadd.s32 1, %s386_s8   ;;  %s448_s6 = smov %s382_s7 }
  0x2e   : > { %p8_p5 = scmp.ge.s32.totalorder %s11_s8, 4   ;;  %s449_s7 = smov %s451_s9 }
  0x30   :  { %10 = sbr.rel (!%p8_p5) target bundleno = 2 (0x2), region = 54 }

// kernel: resnet_roi_head_forward.4
= control target key start
LH: loop header
LB: loop body
LE: loop exit
PB: predicated region body
PF: predicated region fallthrough
CT: control target
= control target key end

     0   :  { %s349_s6 = smov 0   ;;  %s351_s7 = smov 0   ;;  %s391_s0 = inlined_call_operand.vmem [shape: f32[2,4,8,64], index: 0, kind: input, shape index: {}]   ;;  %s392_s1 = inlined_call_operand.vmem [shape: bf16[2,4,128], index: 1, kind: output, shape index: {}]  }
   0x1   :  { %s353_s8 = smov 0  }
   0x2 LB: > { %s23_s9 = sadd.s32 1, %s333_s7  ;;  %p284_p0 = scmp.ge.s32.totalorder %s337_s8, 1  ;;  %s337_s8 = sphi %s353_s8, %s11_s8   ;;  %s333_s7 = sphi %s351_s7, %s394_s7   ;;  %s329_s6 = sphi %s349_s6, %s393_s6  }
   0x3   : > { %p25_p1 = scmp.ge.s32.totalorder %s23_s9, 2  ;;  %p108_p2 = scmp.lt.s32.totalorder %s337_s8, 3 }
   0x5   : > { %s396_s9 = smov (%p25_p1, %s23_s9), 0  ;;  %p109_p3 = pnand %p284_p0, %p108_p2 }
   0x6   : > { %p135_p4 = scmp.lt.s32.totalorder (!%p109_p3), %s329_s6, 1  ;;  %vm155_vm0 = vcmask (!%p109_p3), 523264   ;;  %vm193_vm1 = vcmask (!%p109_p3), 1041409   ;;  %vm195_vm2 = vcmask (!%p109_p3), 1042434   ;;  %vm197_vm3 = vcmask (!%p109_p3), 1043459  }
   0x7   : > { %112 = sbr.rel (%p109_p3) target bundleno = 40 (0x28), region = 24 }
   0xe   : > { %s398_s6 = smov (!%p135_p4, %s329_s6), 1 }
   0xf   : > { %s290_s10 = sshll.u32 %s398_s6, 5  ;;  %s287_s14 = sshll.u32 %s398_s6, 1 }
  0x10   : > { %s142_s13 = scalar_lea.vmem %s391_s0, %s290_s10  ;;  %s150_s17 = scalar_lea.vmem %s392_s1, %s287_s14 }
  0x11   : > { %v151_v0 = vld [vmem:[%s142_s13] sm:$0xff]  ;;  %v152_v1 = vld [vmem:[%s142_s13 + $0x8] sm:$0xff]  ;;  %v153_v2 = vld [vmem:[%s142_s13 + $0x10] sm:$0xff] }
  0x12   : > { %v154_v3 = vld [vmem:[%s142_s13 + $0x18] sm:$0xff]  ;;  %v156_v4 = vsel %vm155_vm0, %v151_v0, 0.0  ;;  %v163_v5 = vsel %vm155_vm0, %v152_v1, 0.0  ;;  %v170_v6 = vsel %vm155_vm0, %v153_v2, 0.0 }
  0x13   : > { %v157_v7 = vrot.slane %v156_v4, 4  ;;  %v164_v8 = vrot.slane %v163_v5, 4  ;;  %v171_v9 = vrot.slane %v170_v6, 4  ;;  %v177_v10 = vsel %vm155_vm0, %v154_v3, 0.0 }
  0x14   : > { %v178_v11 = vrot.slane %v177_v10, 4 }
  0x15   : > { %v158_v12 = vadd.f32 %v157_v7, %v156_v4  ;;  %v165_v13 = vadd.f32 %v164_v8, %v163_v5  ;;  %v172_v14 = vadd.f32 %v171_v9, %v170_v6 }
  0x16   : > { %v179_v15 = vadd.f32 %v178_v11, %v177_v10 }
  0x17   : > { %v159_v16 = vrot.slane %v158_v12, 2  ;;  %v166_v17 = vrot.slane %v165_v13, 2  ;;  %v173_v18 = vrot.slane %v172_v14, 2 }
  0x18   : > { %v180_v19 = vrot.slane %v179_v15, 2 }
  0x19   : > { %v160_v20 = vadd.f32 %v159_v16, %v158_v12  ;;  %v167_v21 = vadd.f32 %v166_v17, %v165_v13  ;;  %v174_v22 = vadd.f32 %v173_v18, %v172_v14 }
  0x1a   : > { %v181_v23 = vadd.f32 %v180_v19, %v179_v15 }
  0x1b   : > { %v161_v24 = vrot.slane %v160_v20, 1  ;;  %v168_v25 = vrot.slane %v167_v21, 1  ;;  %v175_v26 = vrot.slane %v174_v22, 1 }
  0x1c   : > { %v182_v27 = vrot.slane %v181_v23, 1 }
  0x1d   : > { %v162_v28 = vadd.f32 %v161_v24, %v160_v20  ;;  %v169_v29 = vadd.f32 %v168_v25, %v167_v21  ;;  %v176_v30 = vadd.f32 %v175_v26, %v174_v22 }
  0x1e   : > { %v183_v31 = vadd.f32 %v182_v27, %v181_v23 }
  0x1f   : > { %v185_v32 = vmul.f32 0.125, %v162_v28  ;;  %v186_v33 = vmul.f32 0.125, %v169_v29  ;;  %v187_v34 = vmul.f32 0.125, %v176_v30 }
  0x20   : > { %v188_v35 = vmul.f32 0.125, %v183_v31 }
  0x21   : > { %v194_v36 = vsel %vm193_vm1, %v186_v33, %v185_v32 }
  0x22   : > { %v196_v37 = vsel %vm195_vm2, %v187_v34, %v194_v36 }
  0x23   : > { %v198_v38 = vsel %vm197_vm3, %v188_v35, %v196_v37 }
  0x24   : > { %v200_v39 = vsel %vm155_vm0, %v198_v38, 0.0 }
  0x25   : > { %v201_v40 = vpack.c.bf16 %v200_v39, %v200_v39 }
  0x27   : > { %202 = vst [vmem:[%s150_s17] sm:$0x3] %v201_v40 }
  0x28 PF: > { %s11_s8 = sadd.s32 1, %s337_s8   ;;  %s393_s6 = smov %s333_s7 }
  0x29   : > { %p8_p5 = scmp.ge.s32.totalorder %s11_s8, 4   ;;  %s394_s7 = smov %s396_s9 }
  0x2b   :  { %10 = sbr.rel (!%p8_p5) target bundleno = 2 (0x2), region = 54 }

// kernel: custom-call.16
= control target key start
LH: loop header
LB: loop body
LE: loop exit
PB: predicated region body
PF: predicated region fallthrough
CT: control target
= control target key end

     0   :  { %s6_s0 = inlined_call_operand.hbm [shape: f32[3,16], index: 0, kind: output, shape index: {}]  }

// kernel: resnet_roi_head_forward.5
= control target key start
LH: loop header
LB: loop body
LE: loop exit
PB: predicated region body
PF: predicated region fallthrough
CT: control target
= control target key end

     0   :  { %s1396_s0 = inlined_call_operand.vmem [shape: s32[3], index: 0, kind: input, shape index: {}]   ;;  %s1397_s3 = inlined_call_operand.vmem [shape: bf16[2,128,12], index: 3, kind: input, shape index: {}]   ;;  %s1398_s4 = inlined_call_operand.vmem [shape: bf16[3,256,128], index: 4, kind: input, shape index: {}]   ;;  %s1399_s5 = inlined_call_operand.vmem [shape: bf16[12,128], index: 5, kind: input, shape index: {}]   ;;  %s1400_s6 = inlined_call_operand.vmem [shape: f32[1,128], index: 6, kind: input, shape index: {}]   ;;  %s1401_s7 = inlined_call_operand.vmem [shape: f32[48,128], index: 7, kind: output, shape index: {}]   ;;  %s1402_s1 = inlined_call_operand.vmem [shape: s32[3], index: 1, kind: input, shape index: {}]   ;;  %s1403_s2 = inlined_call_operand.vmem [shape: s32[3], index: 2, kind: input, shape index: {}]  }
   0x1   :  { %s12_s26 = sshll.u32 %s1396_s0, 4  ;;  %s16_s29 = sshll.u32 %s1402_s1, 4  ;;  %s13_s26 = int_to_ptr.vmem [resolvable:$true] %s12_s26  ;;  %s17_s29 = int_to_ptr.vmem [resolvable:$true] %s16_s29 }
   0x2   :  { %s1161_s30 = scalar_lea.vmem %s13_s26, 16  ;;  %p1166_p1 = scmp.lt.s32.totalorder %s13_s26, %s13_s26 }
   0x3   :  { %p1162_p0 = scmp.ne.s32.totalorder %s13_s26, %s1161_s30  ;;  %p1167_p2 = scmp.lt.s32.totalorder %s1161_s30, %s1161_s30 }
   0x5   :  { %p1168_p3 = por %p1167_p2, %p1166_p1 }
   0x7   :  { %p1169_p4 = pnand %p1168_p3, %p1162_p0 }
   0x9   :  { %1172 = shalt.err (!%p1169_p4)  }
   0xa   :  { %s1207_s8 = smov [#allocation3]   ;;  %s1173_s9 = scalar_lea.vmem %s17_s29, 16 }
   0xb   :  { %15 = dma.vmem_to_smem %s13_s26, 16, %s1207_s8, [#allocation2] }
   0xc   :  { %p1174_p5 = scmp.ne.s32.totalorder %s17_s29, %s1173_s9  ;;  %p1178_p6 = scmp.lt.s32.totalorder %s17_s29, %s17_s29 }
   0xd   :  { %p1179_p7 = scmp.lt.s32.totalorder %s1173_s9, %s1173_s9 }
   0xf   :  { %p1180_p8 = por %p1179_p7, %p1178_p6 }
  0x11   :  { %p1181_p9 = pnand %p1180_p8, %p1174_p5 }
  0x13   :  { %1184 = shalt.err (!%p1181_p9)  }
  0x14   :  { %s1208_s0 = smov [#allocation4]   ;;  %s20_s11 = sshll.u32 %s1403_s2, 4  ;;  %s21_s11 = int_to_ptr.vmem [resolvable:$true] %s20_s11 }
  0x15   :  { %19 = dma.vmem_to_smem %s17_s29, 16, %s1208_s0, [#allocation2] }
  0x16   :  { %s1185_s12 = scalar_lea.vmem %s21_s11, 16  ;;  %p1190_p11 = scmp.lt.s32.totalorder %s21_s11, %s21_s11 }
  0x17   :  { %p1186_p10 = scmp.ne.s32.totalorder %s21_s11, %s1185_s12  ;;  %p1191_p12 = scmp.lt.s32.totalorder %s1185_s12, %s1185_s12 }
  0x19   :  { %p1192_p13 = por %p1191_p12, %p1190_p11 }
  0x1b   :  { %p1193_p0 = pnand %p1192_p13, %p1186_p10 }
  0x1d   :  { %1196 = shalt.err (!%p1193_p0)  }
  0x1e   :  { %s1209_s13 = smov [#allocation5]  }
  0x1f   :  { %23 = dma.vmem_to_smem %s21_s11, 16, %s1209_s13, [#allocation2] }
  0x20   :  { %1201 = dma.done.wait [#allocation2], 48 }
  0x21   :  { %1202 = vsyncadd [#allocation2], 4294967248 }
  0x22   :  { %25 = sfence }
  0x23   :  { %s1261_s14 = smov 0  }
  0x24 LB: > { %s976_s2 = sadd.s32 4294967295, %s1205_s14   ;;  %p980_p1 = scmp.ge.s32.totalorder %s1205_s14, 1  ;;  %s1205_s14 = sphi %s1261_s14, %s31_s14  }
  0x25   : > { %p197_p2 = scmp.lt.s32.totalorder %s1205_s14, 4 }
  0x27   : > { %p198_p3 = pnand %p980_p1, %p197_p2 }
  0x28   : > { %s230_s15 = sld [smem:[#allocation3 + %s976_s2]] (!%p198_p3)  ;;  %s985_s17 = sshll.u32 (!%p198_p3), %s976_s2, 1 }
  0x29   : > { %201 = sbr.rel (%p198_p3) target bundleno = 892 (0x37c), region = 36  ;;  %s237_s16 = sld [smem:[#allocation4 + %s976_s2]] (!%p198_p3) }
  0x2a   : > { %s251_s18 = sld [smem:[#allocation5 + %s976_s2]] (!%p198_p3)  ;;  %p245_p4 = scmp.lt.s32.totalorder (!%p198_p3), %s985_s17, 5 }
  0x2e   : > { %p231_p5 = scmp.lt.s32.totalorder (!%p198_p3), %s230_s15, 1 }
  0x2f   : > { %p238_p6 = scmp.lt.s32.totalorder (!%p198_p3), %s237_s16, 2 }
  0x30   : > { %s1405_s17 = smov (!%p245_p4, %s985_s17), 5  ;;  %s1407_s15 = smov (!%p231_p5, %s230_s15), 1 }
  0x31   : > { %s986_s19 = sshll.u32 %s1405_s17, 3  ;;  %s1409_s16 = smov (!%p238_p6, %s237_s16), 2 }
  0x32   : > { %s1017_s20 = sshll.u32 %s1407_s15, 6  ;;  %s1272_s23 = scalar_lea.vmem %s1401_s7, %s986_s19 }
  0x33   : > { %s1277_s26 = scalar_lea.vmem %s1397_s3, %s1017_s20  ;;  %s1018_s27 = sshll.u32 %s1409_s16, 7 }
  0x34   : > { %s1282_s30 = scalar_lea.vmem %s1398_s4, %s1018_s27  ;;  %p987_p7 = scmp.le.s32.totalorder %s251_s18, 0 }
  0x35   : > { %v1128_v0 = vld [vmem:[%s1277_s26] sm:$0xff] (!%p987_p7)   ;;  %v1129_v1 = vld [vmem:[%s1277_s26 + $0x8] sm:$0xff] (!%p987_p7)   ;;  %v1130_v2 = vld [vmem:[%s1277_s26 + $0x10] sm:$0xff] (!%p987_p7)   ;;  %vm835_vm0 = vcmask (!%p987_p7), 1045504   ;;  %v1210_v25 = vmov (!%p987_p7), 0.0   ;;  %vm1211_vm1 = vmmov (!%p987_p7), 0  }
  0x36   : > { %255 = sbr.rel (%p987_p7) target bundleno = 892 (0x37c), region = 40  ;;  %1045 = vmatprep.subr.bf16.mxu0 (!%p987_p7), %v1128_v0  ;;  %1099 = vmatprep.subr.bf16.mxu1 (!%p987_p7), %v1128_v0  ;;  %v1131_v3 = vld [vmem:[%s1277_s26 + $0x18] sm:$0xff] (!%p987_p7)   ;;  %v1136_v4 = vld [vmem:[%s1282_s30] sm:$0xff] (!%p987_p7)   ;;  %v1140_v6 = vld [vmem:[%s1282_s30 + $0x50] sm:$0xff] (!%p987_p7)   ;;  %vm610_vm2 = vcmask (!%p987_p7), 97280   ;;  %vm805_vm3 = vcmask (!%p987_p7), 1041409  }
  0x37   : > { %1046 = vmatpush3.bf16.msra.mxu0 (!%p987_p7), %v1128_v0  ;;  %1107 = vmatpush3.bf16.msra.mxu1 (!%p987_p7), %v1128_v0  ;;  %v1132_v5 = vld [vmem:[%s1277_s26 + $0x20] sm:$0xff] (!%p987_p7)   ;;  %v1133_v7 = vld [vmem:[%s1277_s26 + $0x28] sm:$0xff] (!%p987_p7)   ;;  %v1134_v8 = vld [vmem:[%s1277_s26 + $0x30] sm:$0xff] (!%p987_p7)   ;;  %vm807_vm4 = vcmask (!%p987_p7), 1042434   ;;  %vm809_vm5 = vcmask (!%p987_p7), 1043459   ;;  %vm811_vm6 = vcmask (!%p987_p7), 1044484  }
  0x38   : > { %1047 = vmatprep.subr.bf16.mxu0 (!%p987_p7), %v1129_v1  ;;  %1100 = vmatprep.subr.bf16.mxu1 (!%p987_p7), %v1129_v1  ;;  %v1135_v9 = vld [vmem:[%s1277_s26 + $0x38] sm:$0xff] (!%p987_p7)   ;;  %v1137_v10 = vld [vmem:[%s1282_s30 + $0x8] sm:$0xff] (!%p987_p7)   ;;  %v1138_v12 = vld [vmem:[%s1282_s30 + $0x10] sm:$0xff] (!%p987_p7)   ;;  %vm813_vm7 = vcmask (!%p987_p7), 1045509   ;;  %vm815_vm8 = vcmask (!%p987_p7), 1046534   ;;  %vm817_vm9 = vcmask (!%p987_p7), 1047559  }
  0x39   : > { %1061 = vmatprep.mubr.bf16.mxu0 (!%p987_p7), %v1136_v4  ;;  %1081 = vmatprep.mubr.bf16.mxu1 (!%p987_p7), %v1140_v6  ;;  %v1141_v11 = vld [vmem:[%s1282_s30 + $0x58] sm:$0xff] (!%p987_p7)   ;;  %v1144_v13 = vld [vmem:[%s1282_s30 + $0x60] sm:$0xff] (!%p987_p7)   ;;  %v1145_v15 = vld [vmem:[%s1282_s30 + $0x68] sm:$0xff] (!%p987_p7)  }
  0x3a   : > { %v1139_v14 = vld [vmem:[%s1282_s30 + $0x18] sm:$0xff] (!%p987_p7)   ;;  %v1142_v16 = vld [vmem:[%s1282_s30 + $0x20] sm:$0xff] (!%p987_p7)   ;;  %v1148_v17 = vld [vmem:[%s1282_s30 + $0x70] sm:$0xff] (!%p987_p7)  }
  0x3b   : > { %1048 = vmatpush3.bf16.msra.mxu0 (!%p987_p7), %v1129_v1  ;;  %1108 = vmatpush3.bf16.msra.mxu1 (!%p987_p7), %v1129_v1  ;;  %v1143_v18 = vld [vmem:[%s1282_s30 + $0x28] sm:$0xff] (!%p987_p7)   ;;  %v1149_v19 = vld [vmem:[%s1282_s30 + $0x78] sm:$0xff] (!%p987_p7)   ;;  %v1146_v20 = vld [vmem:[%s1282_s30 + $0x30] sm:$0xff] (!%p987_p7)  }
  0x3c   : > { %1049 = vmatprep.subr.bf16.mxu0 (!%p987_p7), %v1130_v2  ;;  %1101 = vmatprep.subr.bf16.mxu1 (!%p987_p7), %v1130_v2  ;;  %v1147_v21 = vld [vmem:[%s1282_s30 + $0x38] sm:$0xff] (!%p987_p7)   ;;  %v1150_v22 = vld [vmem:[%s1282_s30 + $0x40] sm:$0xff] (!%p987_p7)   ;;  %v1151_v23 = vld [vmem:[%s1282_s30 + $0x48] sm:$0xff] (!%p987_p7)  }
  0x3d   : > { %v1152_v24 = vld [vmem:[%s1399_s5] sm:$0x3f]  }
  0x3e   : > { %v837_v26 = vsel %vm835_vm0, %v1152_v24, 0 }
  0x3f   : > { %1050 = vmatpush3.bf16.msra.mxu0 %v1130_v2  ;;  %1109 = vmatpush3.bf16.msra.mxu1 %v1130_v2 }
  0x40   : > { %1051 = vmatprep.subr.bf16.mxu0 %v1131_v3  ;;  %1102 = vmatprep.subr.bf16.mxu1 %v1131_v3 }
  0x43   : > { %1052 = vmatpush3.bf16.msra.mxu0 %v1131_v3  ;;  %1110 = vmatpush3.bf16.msra.mxu1 %v1131_v3 }
  0x44   : > { %1053 = vmatprep.subr.bf16.mxu0 %v1132_v5  ;;  %1103 = vmatprep.subr.bf16.mxu1 %v1132_v5 }
  0x47   : > { %1054 = vmatpush3.bf16.msra.mxu0 %v1132_v5  ;;  %1111 = vmatpush3.bf16.msra.mxu1 %v1132_v5 }
  0x48   : > { %1055 = vmatprep.subr.bf16.mxu0 %v1133_v7  ;;  %1104 = vmatprep.subr.bf16.mxu1 %v1133_v7 }
  0x4b   : > { %1056 = vmatpush3.bf16.msra.mxu0 %v1133_v7  ;;  %1112 = vmatpush3.bf16.msra.mxu1 %v1133_v7 }
  0x4c   : > { %1057 = vmatprep.subr.bf16.mxu0 %v1134_v8  ;;  %1105 = vmatprep.subr.bf16.mxu1 %v1134_v8 }
  0x4f   : > { %1058 = vmatpush3.bf16.msra.mxu0 %v1134_v8  ;;  %1113 = vmatpush3.bf16.msra.mxu1 %v1134_v8 }
  0x50   : > { %1059 = vmatprep.subr.bf16.mxu0 %v1135_v9  ;;  %1106 = vmatprep.subr.bf16.mxu1 %v1135_v9 }
  0x53   : > { %1060 = vmatpush3.bf16.msra.mxu0 %v1135_v9  ;;  %1114 = vmatpush3.bf16.msra.mxu1 %v1135_v9 }
  0x54   : > { %1093 = vmatprep.subr.bf16.mxu1 %v1210_v25 }
  0x56   : > { %1062 = vmatmul.mubr.bf16.vlgmr.msra.gmra.mrb[0].mxu0 %v1137_v10  ;;  %1082 = vmatmul.mubr.bf16.vlgmr.msra.gmra.mrb[0].mxu1 %v1141_v11 }
  0x57   : > { %1065 = vmatprep.mubr.bf16.mxu0 %v1138_v12  ;;  %1085 = vmatprep.mubr.bf16.mxu1 %v1144_v13 }
  0x58   : > { %1094 = vmatpush3.bf16.msra.mxu1 %v837_v26 }
  0x5e   : > { %1066 = vmatmul.mubr.bf16.gmra.mrb[4].mxu0 %v1139_v14  ;;  %1086 = vmatmul.mubr.bf16.gmra.mrb[4].mxu1 %v1145_v15 }
  0x5f   : > { %1069 = vmatprep.mubr.bf16.mxu0 %v1142_v16  ;;  %1089 = vmatprep.mubr.bf16.mxu1 %v1148_v17 }
  0x66   : > { %1070 = vmatmul.mubr.bf16.gmra.mrb[8].mxu0 %v1143_v18  ;;  %1090 = vmatmul.mubr.bf16.gmra.mrb[8].mxu1 %v1149_v19 }
  0x67   : > { %1073 = vmatprep.mubr.bf16.mxu0 %v1146_v20  ;;  %1095 = vmatprep.mubr.msk.bf16.mxu1 %vm1211_vm1, %v1210_v25 }
  0x6e   : > { %1074 = vmatmul.mubr.bf16.gmra.mrb[12].mxu0 %v1147_v21 }
  0x6f   : > { %1077 = vmatprep.mubr.bf16.mxu0 %v1150_v22 }
  0x76   : > { %1078 = vmatmul.mubr.bf16.gmra.mrb[16].mxu0 %v1151_v23 }
 0x129   : > { %v1063_v27 = vpop.f32.mrb[0].mxu0  ;;  %v1083_v28 = vpop.f32.mrb[0].mxu1 }
 0x12a   : > { %v483_v29 = vpop.f32.mrb[1].mxu0  ;;  %v710_v30 = vsel %vm610_vm2, %v1083_v28, -inf  ;;  %v563_v31 = vpop.f32.mrb[1].mxu1  ;;  %v620_v35 = vsel %vm610_vm2, %v1063_v27, -inf }
 0x12b   : > { %v1064_v32 = vpop.f32.mrb[2].mxu0  ;;  %v701_v33 = vsel %vm610_vm2, %v563_v31, -inf  ;;  %v1084_v34 = vpop.f32.mrb[2].mxu1  ;;  %v611_v36 = vsel %vm610_vm2, %v483_v29, -inf }
 0x12c   : > { %v621_v37 = vsel %vm610_vm2, %v1064_v32, -inf  ;;  %v486_v38 = vpop.f32.mrb[3].mxu0  ;;  %v711_v39 = vsel %vm610_vm2, %v1084_v34, -inf  ;;  %v566_v40 = vpop.f32.mrb[3].mxu1 }
 0x12d   : > { %v622_v41 = vmax.f32 %v620_v35, %v621_v37  ;;  %v612_v42 = vsel %vm610_vm2, %v486_v38, -inf  ;;  %v1318_v43 = vmax.f32 %v710_v30, %v711_v39  ;;  %v702_v44 = vsel %vm610_vm2, %v566_v40, -inf }
 0x12e   : > { %v613_v45 = vmax.f32 %v611_v36, %v612_v42  ;;  %v1321_v46 = vmax.f32 %v701_v33, %v702_v44 }
 0x12f   : > { %v623_v47 = vrot.slane %v622_v41, 4 }
 0x130   : > { %v614_v48 = vrot.slane %v613_v45, 4 }
 0x131   : > { %v624_v49 = vmax.f32 %v622_v41, %v623_v47  ;;  %v1067_v50 = vpop.f32.mrb[4].mxu0  ;;  %v1087_v51 = vpop.f32.mrb[4].mxu1  ;;  %v713_v41 = vrot.slane %v1318_v43, 4 }
 0x132   : > { %v615_v52 = vmax.f32 %v613_v45, %v614_v48  ;;  %v499_v53 = vpop.f32.mrb[5].mxu0  ;;  %v579_v54 = vpop.f32.mrb[5].mxu1  ;;  %v728_v57 = vsel %vm610_vm2, %v1087_v51, -inf  ;;  %v638_v60 = vsel %vm610_vm2, %v1067_v50, -inf  ;;  %v704_v48 = vrot.slane %v1321_v46, 4 }
 0x133   : > { %v625_v55 = vrot.slane %v624_v49, 2  ;;  %v1068_v56 = vpop.f32.mrb[6].mxu0  ;;  %v1088_v58 = vpop.f32.mrb[6].mxu1  ;;  %v629_v2 = vsel %vm610_vm2, %v499_v53, -inf  ;;  %v719_v7 = vsel %vm610_vm2, %v579_v54, -inf }
 0x134   : > { %v616_v59 = vrot.slane %v615_v52, 2  ;;  %v639_v61 = vsel %vm610_vm2, %v1068_v56, -inf  ;;  %v502_v62 = vpop.f32.mrb[7].mxu0  ;;  %v729_v63 = vsel %vm610_vm2, %v1088_v58, -inf  ;;  %v582_v0 = vpop.f32.mrb[7].mxu1  ;;  %v1347_v56 = vmax.f32 %v1318_v43, %v713_v41 }
 0x135   : > { %v626_v1 = vmax.f32 %v624_v49, %v625_v55  ;;  %v640_v3 = vmax.f32 %v638_v60, %v639_v61  ;;  %v630_v4 = vsel %vm610_vm2, %v502_v62, -inf  ;;  %v1330_v8 = vmax.f32 %v728_v57, %v729_v63 }
 0x136   : > { %v617_v5 = vmax.f32 %v615_v52, %v616_v59  ;;  %v631_v6 = vmax.f32 %v629_v2, %v630_v4  ;;  %v720_v11 = vsel %vm610_vm2, %v582_v0, -inf  ;;  %v1350_v61 = vmax.f32 %v1321_v46, %v704_v48 }
 0x137   : > { %v627_v9 = vrot.slane %v626_v1, 1  ;;  %v641_v10 = vrot.slane %v640_v3, 4  ;;  %v1333_v17 = vmax.f32 %v719_v7, %v720_v11 }
 0x138   : > { %v618_v12 = vrot.slane %v617_v5, 1  ;;  %v632_v13 = vrot.slane %v631_v6, 4 }
 0x139   : > { %v628_v14 = vmax.f32 %v626_v1, %v627_v9  ;;  %v642_v15 = vmax.f32 %v640_v3, %v641_v10  ;;  %v1071_v16 = vpop.f32.mrb[8].mxu0  ;;  %v1091_v18 = vpop.f32.mrb[8].mxu1  ;;  %v722_v62 = vrot.slane %v1333_v17, 4 }
 0x13a   : > { %v619_v19 = vmax.f32 %v617_v5, %v618_v12  ;;  %v633_v20 = vmax.f32 %v631_v6, %v632_v13  ;;  %v515_v21 = vpop.f32.mrb[9].mxu0  ;;  %v1335_v22 = vpop.f32.mrb[9].mxu1  ;;  %v656_v29 = vsel %vm610_vm2, %v1071_v16, -inf  ;;  %v746_v4 = vsel %vm610_vm2, %v1091_v18, -inf }
 0x13b   : > { %v756_v23 = vpack.c.bf16 %v628_v14, %v628_v14  ;;  %v643_v24 = vrot.slane %v642_v15, 2  ;;  %v1072_v25 = vpop.f32.mrb[10].mxu0  ;;  %v1092_v26 = vpop.f32.mrb[10].mxu1  ;;  %v647_v38 = vsel %vm610_vm2, %v515_v21, -inf  ;;  %v731_v13 = vrot.slane %v1330_v8, 4 }
 0x13c   : > { %v755_v27 = vpack.c.bf16 %v619_v19, %v619_v19  ;;  %v634_v28 = vrot.slane %v633_v20, 2  ;;  %v657_v30 = vsel %vm610_vm2, %v1072_v25, -inf  ;;  %v518_v31 = vpop.f32.mrb[11].mxu0  ;;  %v1339_v32 = vpop.f32.mrb[11].mxu1  ;;  %v737_v25 = vsel %vm610_vm2, %v1335_v22, -inf }
 0x13d   : > { %v790_v33 = vunpack.c.l.b16 %v756_v23  ;;  %v644_v34 = vmax.f32 %v642_v15, %v643_v24  ;;  %v658_v35 = vmax.f32 %v656_v29, %v657_v30  ;;  %v648_v39 = vsel %vm610_vm2, %v518_v31, -inf }
 0x13e   : > { %v789_v36 = vunpack.c.l.b16 %v755_v27  ;;  %v635_v37 = vmax.f32 %v633_v20, %v634_v28  ;;  %v649_v44 = vmax.f32 %v647_v38, %v648_v39  ;;  %v747_v15 = vsel %vm610_vm2, %v1092_v26, -inf }
 0x13f   : > { %v645_v40 = vrot.slane %v644_v34, 1  ;;  %v659_v42 = vrot.slane %v658_v35, 4  ;;  %v723_v20 = vmax.f32 %v1333_v17, %v722_v62  ;;  %v748_v27 = vmax.f32 %v746_v4, %v747_v15 }
 0x140   : > { %v806_v45 = vsel %vm805_vm3, %v790_v33, %v789_v36  ;;  %v636_v47 = vrot.slane %v635_v37, 1  ;;  %v650_v51 = vrot.slane %v649_v44, 4  ;;  %v738_v26 = vsel %vm610_vm2, %v1339_v32, -inf }
 0x141   : > { %v646_v49 = vmax.f32 %v644_v34, %v645_v40  ;;  %v660_v50 = vmax.f32 %v658_v35, %v659_v42  ;;  %v1075_v52 = vpop.f32.mrb[12].mxu0  ;;  %v715_v31 = vrot.slane %v1347_v56, 2  ;;  %v706_v36 = vrot.slane %v1350_v61, 2 }
 0x142   : > { %v637_v53 = vmax.f32 %v635_v37, %v636_v47  ;;  %v531_v54 = vpop.f32.mrb[13].mxu0  ;;  %v651_v58 = vmax.f32 %v649_v44, %v650_v51  ;;  %v674_v3 = vsel %vm610_vm2, %v1075_v52, -inf  ;;  %v749_v38 = vrot.slane %v748_v27, 4 }
 0x143   : > { %v758_v55 = vpack.c.bf16 %v646_v49, %v646_v49  ;;  %v661_v57 = vrot.slane %v660_v50, 2  ;;  %v1076_v59 = vpop.f32.mrb[14].mxu0  ;;  %v665_v5 = vsel %vm610_vm2, %v531_v54, -inf  ;;  %v739_v22 = vmax.f32 %v737_v25, %v738_v26 }
 0x144   : > { %v757_v60 = vpack.c.bf16 %v637_v53, %v637_v53  ;;  %v675_v63 = vsel %vm610_vm2, %v1076_v59, -inf  ;;  %v534_v0 = vpop.f32.mrb[15].mxu0  ;;  %v652_v2 = vrot.slane %v651_v58, 2  ;;  %v732_v39 = vmax.f32 %v1330_v8, %v731_v13 }
 0x145   : > { %v662_v1 = vmax.f32 %v660_v50, %v661_v57  ;;  %v676_v6 = vmax.f32 %v674_v3, %v675_v63  ;;  %v666_v7 = vsel %vm610_vm2, %v534_v0, -inf  ;;  %v792_v9 = vunpack.c.l.b16 %v758_v55 }
 0x146   : > { %v791_v43 = vunpack.c.l.b16 %v757_v60  ;;  %v653_v10 = vmax.f32 %v651_v58, %v652_v2  ;;  %v667_v11 = vmax.f32 %v665_v5, %v666_v7  ;;  %v724_v40 = vrot.slane %v723_v20, 2 }
 0x147   : > { %v663_v46 = vrot.slane %v662_v1, 1  ;;  %v677_v14 = vrot.slane %v676_v6, 4  ;;  %v750_v53 = vmax.f32 %v748_v27, %v749_v38  ;;  %v733_v60 = vrot.slane %v732_v39, 2 }
 0x148   : > { %v808_v12 = vsel %vm807_vm4, %v791_v43, %v806_v45  ;;  %v654_v19 = vrot.slane %v653_v10, 1  ;;  %v668_v24 = vrot.slane %v667_v11, 4  ;;  %v740_v45 = vrot.slane %v739_v22, 4 }
 0x149   : > { %v664_v16 = vmax.f32 %v662_v1, %v663_v46  ;;  %v810_v18 = vsel %vm809_vm5, %v792_v9, %v808_v12  ;;  %v1079_v21 = vpop.f32.mrb[16].mxu0  ;;  %v678_v23 = vmax.f32 %v676_v6, %v677_v14  ;;  %v716_v0 = vmax.f32 %v1347_v56, %v715_v31 }
 0x14a   : > { %v547_v28 = vpop.f32.mrb[17].mxu0  ;;  %v655_v29 = vmax.f32 %v653_v10, %v654_v19  ;;  %v669_v17 = vmax.f32 %v667_v11, %v668_v24  ;;  %v692_v32 = vsel %vm610_vm2, %v1079_v21, -inf  ;;  %v741_v54 = vmax.f32 %v739_v22, %v740_v45 }
 0x14b   : > { %v1080_v30 = vpop.f32.mrb[18].mxu0  ;;  %v760_v33 = vpack.c.bf16 %v664_v16, %v664_v16  ;;  %v679_v34 = vrot.slane %v678_v23, 2  ;;  %v683_v59 = vsel %vm610_vm2, %v547_v28, -inf  ;;  %v707_v1 = vmax.f32 %v1350_v61, %v706_v36 }
 0x14c   : > { %v550_v35 = vpop.f32.mrb[19].mxu0  ;;  %v759_v37 = vpack.c.bf16 %v655_v29, %v655_v29  ;;  %v670_v42 = vrot.slane %v669_v17, 2  ;;  %v693_v47 = vsel %vm610_vm2, %v1080_v30, -inf  ;;  %v742_v3 = vrot.slane %v741_v54, 2 }
 0x14d   : > { %v680_v41 = vmax.f32 %v678_v23, %v679_v34  ;;  %v794_v48 = vunpack.c.l.b16 %v760_v33  ;;  %v694_v51 = vmax.f32 %v692_v32, %v693_v47  ;;  %v684_v55 = vsel %vm610_vm2, %v550_v35, -inf }
 0x14e   : > { %v793_v44 = vunpack.c.l.b16 %v759_v37  ;;  %v671_v50 = vmax.f32 %v669_v17, %v670_v42  ;;  %v685_v63 = vmax.f32 %v683_v59, %v684_v55  ;;  %v751_v43 = vrot.slane %v750_v53, 2 }
 0x14f   : > { %v681_v49 = vrot.slane %v680_v41, 1  ;;  %v695_v62 = vrot.slane %v694_v51, 4  ;;  %v725_v7 = vmax.f32 %v723_v20, %v724_v40  ;;  %v734_v46 = vmax.f32 %v732_v39, %v733_v60 }
 0x150   : > { %v812_v52 = vsel %vm811_vm6, %v793_v44, %v810_v18  ;;  %v672_v57 = vrot.slane %v671_v50, 1  ;;  %v686_v6 = vrot.slane %v685_v63, 4  ;;  %v717_v12 = vrot.slane %v716_v0, 1 }
 0x151   : > { %v682_v8 = vmax.f32 %v680_v41, %v681_v49  ;;  %v814_v58 = vsel %vm813_vm7, %v794_v48, %v812_v52  ;;  %v696_v5 = vmax.f32 %v694_v51, %v695_v62  ;;  %v708_v13 = vrot.slane %v707_v1, 1  ;;  %v1014_v62 = vld [vmem:[%s1400_s6] ss:$0 sm:$0xff] }
 0x152   : > { %v673_v2 = vmax.f32 %v671_v50, %v672_v57  ;;  %v687_v11 = vmax.f32 %v685_v63, %v686_v6  ;;  %v743_v15 = vmax.f32 %v741_v54, %v742_v3  ;;  %v752_v16 = vmax.f32 %v750_v53, %v751_v43 }
 0x153   : > { %v762_v4 = vpack.c.bf16 %v682_v8, %v682_v8  ;;  %v697_v10 = vrot.slane %v696_v5, 2  ;;  %v726_v18 = vrot.slane %v725_v7, 1  ;;  %v735_v23 = vrot.slane %v734_v46, 1 }
 0x154   : > { %v761_v9 = vpack.c.bf16 %v673_v2, %v673_v2  ;;  %v688_v19 = vrot.slane %v687_v11, 2  ;;  %v709_v27 = vmax.f32 %v707_v1, %v708_v13  ;;  %v744_v28 = vrot.slane %v743_v15, 1 }
 0x155   : > { %v796_v56 = vunpack.c.l.b16 %v762_v4  ;;  %v698_v61 = vmax.f32 %v696_v5, %v697_v10  ;;  %v718_v29 = vmax.f32 %v716_v0, %v717_v12  ;;  %v753_v26 = vrot.slane %v752_v16, 1 }
 0x156   : > { %v795_v14 = vunpack.c.l.b16 %v761_v9  ;;  %v689_v25 = vmax.f32 %v687_v11, %v688_v19  ;;  %v727_v33 = vmax.f32 %v725_v7, %v726_v18  ;;  %v736_v34 = vmax.f32 %v734_v46, %v735_v23 }
 0x157   : > { %v699_v24 = vrot.slane %v698_v61, 1  ;;  %v765_v36 = vpack.c.bf16 %v709_v27, %v709_v27  ;;  %v745_v37 = vmax.f32 %v743_v15, %v744_v28  ;;  %v766_v38 = vpack.c.bf16 %v718_v29, %v718_v29 }
 0x158   : > { %v816_v21 = vsel %vm815_vm8, %v795_v14, %v814_v58  ;;  %v690_v31 = vrot.slane %v689_v25, 1  ;;  %v754_v22 = vmax.f32 %v752_v16, %v753_v26  ;;  %v767_v41 = vpack.c.bf16 %v727_v33, %v727_v33 }
 0x159   : > { %v818_v20 = vsel %vm817_vm9, %v796_v56, %v816_v21  ;;  %v700_v30 = vmax.f32 %v698_v61, %v699_v24  ;;  %v768_v42 = vpack.c.bf16 %v736_v34, %v736_v34  ;;  %v799_v45 = vunpack.c.l.b16 %v765_v36 }
 0x15a   : > { %v691_v35 = vmax.f32 %v689_v25, %v690_v31  ;;  %v769_v32 = vpack.c.bf16 %v745_v37, %v745_v37  ;;  %v800_v47 = vunpack.c.l.b16 %v766_v38  ;;  %v770_v48 = vpack.c.bf16 %v754_v22, %v754_v22 }
 0x15b   : > { %v764_v17 = vpack.c.bf16 %v700_v30, %v700_v30  ;;  %v801_v50 = vunpack.c.l.b16 %v767_v41  ;;  %v802_v52 = vunpack.c.l.b16 %v768_v42 }
 0x15c   : > { %v763_v40 = vpack.c.bf16 %v691_v35, %v691_v35  ;;  %v803_v54 = vunpack.c.l.b16 %v769_v32  ;;  %v804_v8 = vunpack.c.l.b16 %v770_v48 }
 0x15d   : > { %v798_v39 = vunpack.c.l.b16 %v764_v17 }
 0x15e   : > { %v797_v44 = vunpack.c.l.b16 %v763_v40 }
 0x160   : > { %v819_v49 = vsel %vm805_vm3, %v798_v39, %v797_v44 }
 0x161   : > { %v820_v51 = vsel %vm807_vm4, %v799_v45, %v819_v49 }
 0x162   : > { %v821_v53 = vsel %vm809_vm5, %v800_v47, %v820_v51 }
 0x163   : > { %v822_v55 = vsel %vm811_vm6, %v801_v50, %v821_v53 }
 0x164   : > { %v823_v57 = vsel %vm813_vm7, %v802_v52, %v822_v55 }
 0x165   : > { %v824_v58 = vsel %vm815_vm8, %v803_v54, %v823_v57 }
 0x166   : > { %v825_v59 = vsel %vm817_vm9, %v804_v8, %v824_v58 }
 0x167   : > { %v826_v60 = vpack.c.b16 %v825_v59, %v818_v20 }
 0x169   : > { %1096 = vmatmul.mubr.msk.bf16.vlgmr.msra.gmra.mrb[12].mxu1 %vm610_vm2, %v826_v60 }
 0x23c   : > { %v873_v63 = vpop.f32.mrb[12].mxu1 }
 0x23d   : > { %v886_v0 = vadd.f32 %v1014_v62, %v873_v63  ;;  %v1097_v1 = vpop.f32.mrb[13].mxu1 }
 0x23e   : > { %v876_v2 = vpop.f32.mrb[14].mxu1 }
 0x23f   : > { %v1098_v3 = vpop.f32.mrb[15].mxu1  ;;  %888 = vmax.xlane.f32.xlu0 %v886_v0  ;;  %v887_v4 = vadd.f32 %v1014_v62, %v876_v2 }
 0x243   : > { %890 = vmax.xlane.f32.xlu0 %v887_v4 }
 0x2cc   : > { %v889_v43 = vpop.xlane.xlu0 %888 }
 0x2cd   : > { %v892_v5 = vsub.f32 %v886_v0, %v889_v43 }
 0x2cf   : > { %v894_v6 = vmul.f32 1.442695, %v892_v5 }
 0x2d0   : > { %v891_v7 = vpop.xlane.xlu0 %890 }
 0x2d1   : > { %1153 = vpow2.f32 %v894_v6  ;;  %v893_v9 = vsub.f32 %v887_v4, %v891_v7 }
 0x2d3   : > { %v896_v46 = vmul.f32 1.442695, %v893_v9 }
 0x2d5   : > { %1155 = vpow2.f32 %v896_v46 }
 0x2db   : > { %v1154_v10 = vpop.eup %1153 }
 0x2dc   : > { %898 = vadd.xlane.f32.xlu1 %v1154_v10 }
 0x2df   : > { %v1156_v11 = vpop.eup %1155 }
 0x2e0   : > { %900 = vadd.xlane.f32.xlu1 %v1156_v11 }
 0x369   : > { %v899_v12 = vpop.xlane.xlu1 %898 }
 0x36a   : > { %1157 = vrcp.f32 %v899_v12 }
 0x36d   : > { %v901_v13 = vpop.xlane.xlu1 %900 }
 0x36e   : > { %1159 = vrcp.f32 %v901_v13 }
 0x374   : > { %v1158_v14 = vpop.eup %1157 }
 0x375   : > { %v904_v15 = vmul.f32 %v1158_v14, %v1154_v10 }
 0x377   : > { %906 = vst [vmem:[%s1272_s23] sm:$0xff] %v904_v15 }
 0x378   : > { %v1160_v56 = vpop.eup %1159 }
 0x379   : > { %v905_v16 = vmul.f32 %v1160_v56, %v1156_v11 }
 0x37b   : > { %907 = vst [vmem:[%s1272_s23 + $0x8] sm:$0xff] %v905_v16 }
 0x37c PF: > { %s31_s14 = sadd.s32 1, %s1205_s14  }
 0x37d   : > { %p28_p8 = scmp.ge.s32.totalorder %s31_s14, 5  }
 0x37f   :  { %30 = sbr.rel (!%p28_p8) target bundleno = 36 (0x24), region = 73 }

</bundles_post_ra>
